<compile_context>
chip_gen: v5e
topology: v5e:2x2
jax: 0.10.0
libtpu: 0.0.40
codegen_flags: <defaults>
</compile_context>

<pallas_src>
import jax
import jax.numpy as jnp
from jax import lax
from jax.experimental import pallas as pl
from jax.experimental.pallas import tpu as pltpu

LANE = 128      # lane width; every padded feature dim is a multiple of this
D_PAD = LANE    # padded hidden width


def _kernel_b1(x1_ref, x2_ref, w_ref, b_ref, o_ref, xpad_ref):
    """B == 1 specialization.

    scores = k @ q^T is (1, 1), so softmax(scores) == 1 and out == value(v3).
    Only the shared Linear and the value projection survive:
        v3  = (x1 + x2) @ W_lin + 2*b_lin     (bias pre-doubled at pack time)
        out = v3 @ W_v + b_v
    Slabs: w = [W_lin | W_v] (128, 256); b = [2*b_lin | b_v] (B, 256).
    """
    d_in = x1_ref.shape[1]
    d = w_ref.shape[1] // 2

    # Zero-extend (B, d_in) -> (B, 128) entirely inside VMEM (no wrapper pad).
    xpad_ref[...] = jnp.zeros_like(xpad_ref)
    xpad_ref[:, :d_in] = x1_ref[...] + x2_ref[...]
    x = xpad_ref[...]

    w = w_ref[...]
    b = b_ref[...]

    v3 = jnp.dot(x, w[:, :d], preferred_element_type=jnp.float32) + b[:, :d]
    out = jnp.dot(v3, w[:, d:], preferred_element_type=jnp.float32) + b[:, d:]
    o_ref[...] = out.astype(o_ref.dtype)


def _kernel_general(x1_ref, x2_ref, w_ref, b_ref, o_ref, xpad_ref):
    """General-batch path: full K/Q/V + softmax attention.
    Slabs: w = [W_lin | W_k | W_q | W_v] (128, 512); b matching (B, 512).
    Zero-padded feature lanes stay exactly zero through every stage, so the
    padding never changes the math (softmax is over the batch dim, not lanes).
    """
    d_in = x1_ref.shape[1]
    d = w_ref.shape[1] // 4

    xpad_ref[...] = jnp.zeros_like(xpad_ref)
    xpad_ref[:, :d_in] = x1_ref[...] + x2_ref[...]
    x = xpad_ref[...]

    w = w_ref[...]
    b = b_ref[...]

    # shared Linear (bias pre-doubled at pack time: (x1+x2)@W + 2b)
    v3 = jnp.dot(x, w[:, :d], preferred_element_type=jnp.float32) + b[:, :d]

    # fused K/Q/V projection: one MXU pass, then lane-tile-aligned slices
    kqv = jnp.dot(v3, w[:, d:], preferred_element_type=jnp.float32) + b[:, d:]
    k = kqv[:, 0 * d:1 * d]
    q = kqv[:, 1 * d:2 * d]
    v = kqv[:, 2 * d:3 * d]

    # scores = k @ q^T without materializing a transpose (contract last dims)
    scores = lax.dot_general(
        k, q, dimension_numbers=(((1,), (1,)), ((), ())),
        preferred_element_type=jnp.float32)                       # (B, B)

    # numerically stable softmax along the last dim
    m = jnp.max(scores, axis=-1, keepdims=True)
    e = jnp.exp(scores - m)
    s = jnp.sum(e, axis=-1, keepdims=True)
    probs = e * pl.reciprocal(s)          # exact reciprocal (tight accuracy)

    out = jnp.dot(probs, v, preferred_element_type=jnp.float32)   # (B, 128) lane-dense
    o_ref[...] = out.astype(o_ref.dtype)


def _pad2(a, rows, cols):
    return jnp.pad(a, ((0, rows - a.shape[0]), (0, cols - a.shape[1])))


def pack_params(params, batch):
    """Pack weights/biases into lane-aligned slabs.  Runs ONCE at build time,
    not per forward call.  Weights stored [in, out] (x @ W + b)."""
    if batch == 1:
        w = jnp.concatenate([_pad2(params["w_lin"], D_PAD, D_PAD),
                             _pad2(params["w_v"], D_PAD, D_PAD)], axis=1)   # (128, 256)
        b = jnp.concatenate([_pad2(2.0 * params["b_lin"], 1, D_PAD),
                             _pad2(params["b_v"], 1, D_PAD)], axis=1)       # (1, 256)
    else:
        w = jnp.concatenate([_pad2(params["w_lin"], D_PAD, D_PAD),
                             _pad2(params["w_k"], D_PAD, D_PAD),
                             _pad2(params["w_q"], D_PAD, D_PAD),
                             _pad2(params["w_v"], D_PAD, D_PAD)], axis=1)   # (128, 512)
        b = jnp.concatenate([_pad2(2.0 * params["b_lin"], 1, D_PAD),
                             _pad2(params["b_k"], 1, D_PAD),
                             _pad2(params["b_q"], 1, D_PAD),
                             _pad2(params["b_v"], 1, D_PAD)], axis=1)       # (1, 512)
    # Pre-broadcast bias to B rows -> plain full-shape VPU add inside the kernel.
    b = jnp.tile(b, (batch, 1))
    return w, b


def build_attn_mlp(params, batch):
    """Packs parameters once and returns a jitted forward fn (x1, x2) -> (B, 10)."""
    d_in = params["w_lin"].shape[0]
    d_out = params["w_v"].shape[1]
    w_all, b_all = pack_params(params, batch)   # one-time; cached in the closure

    if batch == 1:
        kernel = _kernel_b1
        flops = 2 * 1 * D_PAD * D_PAD * 2               # shared Linear + value proj
        transcendentals = 0
    else:
        kernel = _kernel_general
        flops = (2 * batch * D_PAD * D_PAD              # shared Linear
                 + 2 * batch * D_PAD * 3 * D_PAD        # fused K/Q/V
                 + 2 * batch * batch * D_PAD            # scores
                 + 2 * batch * batch * D_PAD)           # probs @ v
        transcendentals = batch * batch

    bytes_accessed = 4 * (2 * batch * d_in + w_all.size + b_all.size + batch * D_PAD)
    vmem = pl.BlockSpec(memory_space=pltpu.MemorySpace.VMEM)

    call = pl.pallas_call(
        kernel,
        out_shape=jax.ShapeDtypeStruct((batch, D_PAD), jnp.float32),
        in_specs=[vmem, vmem, vmem, vmem],
        out_specs=vmem,
        scratch_shapes=[pltpu.VMEM((batch, D_PAD), jnp.float32)],
        compiler_params=pltpu.CompilerParams(vmem_limit_bytes=1 * 1024 * 1024),
        cost_estimate=pl.CostEstimate(flops=flops,
                                      transcendentals=transcendentals,
                                      bytes_accessed=bytes_accessed),
    )

    # TODO(synk): if this forward runs repeatedly per step, amortize launch/DMA
    # overhead by folding N steps into one pallas_call with a constant-index
    # weight BlockSpec (weights fetched once, pipelined over steps).
    @jax.jit
    def fwd(x1, x2):
        return call(x1, x2, w_all, b_all)[:, :d_out]

    return fwd


def _ref(x1, x2, p):
    # Force true-f32 matmuls in the XLA reference (TPU default precision demotes).
    hp = lax.Precision.HIGHEST
    v1 = jnp.dot(x1, p["w_lin"], precision=hp) + p["b_lin"]
    v2 = jnp.dot(x2, p["w_lin"], precision=hp) + p["b_lin"]
    v3 = v1 + v2
    v4 = jnp.dot(v3, p["w_k"], precision=hp) + p["b_k"]
    v5 = jnp.dot(v3, p["w_q"], precision=hp) + p["b_q"]
    v6 = jnp.dot(v3, p["w_v"], precision=hp) + p["b_v"]
    v7 = jnp.dot(v4, v5.T, precision=hp)
    v8 = jax.nn.softmax(v7, axis=-1)
    return jnp.dot(v8, v6, precision=hp)


if __name__ == "__main__":
    key = jax.random.PRNGKey(0)
    ks = jax.random.split(key, 12)

    d_in, d_hid = 25, 10

    # Deterministic synthetic parameters (Linear(25,10), 3x Linear(10,10)),
    # stored [in, out] so x @ W + b matches torch's Linear semantics.
    params = {
        "w_lin": jax.random.normal(ks[0], (d_in, d_hid), jnp.float32) * 0.2,
        "b_lin": jax.random.normal(ks[1], (1, d_hid), jnp.float32) * 0.1,
        "w_k":   jax.random.normal(ks[2], (d_hid, d_hid), jnp.float32) * 0.3,
        "b_k":   jax.random.normal(ks[3], (1, d_hid), jnp.float32) * 0.1,
        "w_q":   jax.random.normal(ks[4], (d_hid, d_hid), jnp.float32) * 0.3,
        "b_q":   jax.random.normal(ks[5], (1, d_hid), jnp.float32) * 0.1,
        "w_v":   jax.random.normal(ks[6], (d_hid, d_hid), jnp.float32) * 0.3,
        "b_v":   jax.random.normal(ks[7], (1, d_hid), jnp.float32) * 0.1,
    }

    # --- B = 1: exactly the original module (x1, x2 = randn(1, 25)) -------------
    x1 = jax.random.normal(ks[8], (1, d_in), jnp.float32)
    x2 = jax.random.normal(ks[9], (1, d_in), jnp.float32)

    fwd1 = build_attn_mlp(params, batch=1)   # packs params ONCE, outside the call path
    out1 = fwd1(x1, x2)
    jax.block_until_ready(out1)

    ref1 = _ref(x1, x2, params)
    assert out1.shape == (1, d_hid), out1.shape
    assert jnp.allclose(out1, ref1, atol=1e-4, rtol=1e-4), (out1, ref1)

    # --- B = 4: exercises the full K/Q/V + softmax attention path ---------------
    B = 4
    x1b = jax.random.normal(ks[10], (B, d_in), jnp.float32)
    x2b = jax.random.normal(ks[11], (B, d_in), jnp.float32)

    fwdb = build_attn_mlp(params, batch=B)
    outb = fwdb(x1b, x2b)
    jax.block_until_ready(outb)

    refb = _ref(x1b, x2b, params)
    assert outb.shape == (B, d_hid), outb.shape
    assert jnp.allclose(outb, refb, atol=1e-4, rtol=1e-4), (outb, refb)

    print("KERNEL_OK")
</pallas_src>

<mosaic_0001>
module attributes {stable_mosaic.version = 11 : i64} {
  func.func @_kernel_b1(%arg0: memref<1x25xf32, #tpu.memory_space<vmem>>, %arg1: memref<1x25xf32, #tpu.memory_space<vmem>>, %arg2: memref<128x256xf32, #tpu.memory_space<vmem>>, %arg3: memref<1x256xf32, #tpu.memory_space<vmem>>, %arg4: memref<1x128xf32, #tpu.memory_space<vmem>>, %arg5: memref<1x128xf32, #tpu.memory_space<vmem>>) attributes {dimension_semantics = [], scalar_prefetch = 0 : i64, scratch_operands = 1 : i64, tpu.core_type = #tpu.core_type<tc>} {
    %cst = arith.constant 0.000000e+00 : f32
    %0 = vector.broadcast %cst : f32 to vector<1x128xf32>
    %c0 = arith.constant 0 : index
    %c0_0 = arith.constant 0 : index
    %1 = vector.load %arg5[%c0, %c0_0] : memref<1x128xf32, #tpu.memory_space<vmem>>, vector<1x128xf32>
    tpu.vector_store %arg5[%c0, %c0_0], %0 {strides = array<i32>} : memref<1x128xf32, #tpu.memory_space<vmem>>, vector<1x128xf32>,
    %c0_1 = arith.constant 0 : index
    %c0_2 = arith.constant 0 : index
    %2 = vector.load %arg0[%c0_1, %c0_2] : memref<1x25xf32, #tpu.memory_space<vmem>>, vector<1x25xf32>
    %c0_3 = arith.constant 0 : index
    %c0_4 = arith.constant 0 : index
    %3 = vector.load %arg1[%c0_3, %c0_4] : memref<1x25xf32, #tpu.memory_space<vmem>>, vector<1x25xf32>
    %4 = arith.addf %2, %3 : vector<1x25xf32>
    %c0_5 = arith.constant 0 : index
    %c0_6 = arith.constant 0 : index
    %5 = vector.load %arg5[%c0_5, %c0_6] : memref<1x128xf32, #tpu.memory_space<vmem>>, vector<1x25xf32>
    tpu.vector_store %arg5[%c0_5, %c0_6], %4 {strides = array<i32>} : memref<1x128xf32, #tpu.memory_space<vmem>>, vector<1x25xf32>,
    %c0_7 = arith.constant 0 : index
    %c0_8 = arith.constant 0 : index
    %6 = vector.load %arg5[%c0_7, %c0_8] : memref<1x128xf32, #tpu.memory_space<vmem>>, vector<1x128xf32>
    %c0_9 = arith.constant 0 : index
    %c0_10 = arith.constant 0 : index
    %7 = vector.load %arg2[%c0_9, %c0_10] : memref<128x256xf32, #tpu.memory_space<vmem>>, vector<128x256xf32>
    %c0_11 = arith.constant 0 : index
    %c0_12 = arith.constant 0 : index
    %8 = vector.load %arg3[%c0_11, %c0_12] : memref<1x256xf32, #tpu.memory_space<vmem>>, vector<1x256xf32>
    %9 = vector.extract_strided_slice %7 {offsets = [0, 0], sizes = [128, 128], strides = [1, 1]} : vector<128x256xf32> to vector<128x128xf32>
    %cst_13 = arith.constant dense<0.000000e+00> : vector<1x128xf32>
    %10 = tpu.matmul %6, %9, %cst_13 {dimension_numbers = #tpu.dot_dimension_numbers<[1], [0], [0], [1], [0, 0, 1, 1], [], []>} : vector<1x128xf32>, vector<128x128xf32>, vector<1x128xf32> -> vector<1x128xf32>
    %11 = vector.extract_strided_slice %8 {offsets = [0, 0], sizes = [1, 128], strides = [1, 1]} : vector<1x256xf32> to vector<1x128xf32>
    %12 = arith.addf %10, %11 : vector<1x128xf32>
    %13 = vector.extract_strided_slice %7 {offsets = [0, 128], sizes = [128, 128], strides = [1, 1]} : vector<128x256xf32> to vector<128x128xf32>
    %cst_14 = arith.constant dense<0.000000e+00> : vector<1x128xf32>
    %14 = tpu.matmul %12, %13, %cst_14 {dimension_numbers = #tpu.dot_dimension_numbers<[1], [0], [0], [1], [0, 0, 1, 1], [], []>} : vector<1x128xf32>, vector<128x128xf32>, vector<1x128xf32> -> vector<1x128xf32>
    %15 = vector.extract_strided_slice %8 {offsets = [0, 128], sizes = [1, 128], strides = [1, 1]} : vector<1x256xf32> to vector<1x128xf32>
    %16 = arith.addf %14, %15 : vector<1x128xf32>
    %c0_15 = arith.constant 0 : index
    %c0_16 = arith.constant 0 : index
    %17 = vector.load %arg4[%c0_15, %c0_16] : memref<1x128xf32, #tpu.memory_space<vmem>>, vector<1x128xf32>
    tpu.vector_store %arg4[%c0_15, %c0_16], %16 {strides = array<i32>} : memref<1x128xf32, #tpu.memory_space<vmem>>, vector<1x128xf32>,
    return
  }
}

</mosaic_0001>

<bundles_post_ra>
// kernel: fwd.1
= control target key start
LH: loop header
LB: loop body
LE: loop exit
PB: predicated region body
PF: predicated region fallthrough
CT: control target
= control target key end

     0   :  { %9 = vsyncpa [#allocation4], 0  ;;  %s319_s0 = inlined_call_operand.hbm [shape: f32[1,25], index: 0, kind: input, shape index: {}]   ;;  %s320_s1 = inlined_call_operand.hbm [shape: f32[1,25], index: 1, kind: input, shape index: {}]   ;;  %s321_s2 = inlined_call_operand.hbm [shape: f32[128,256], index: 2, kind: input, shape index: {}]   ;;  %s322_s3 = inlined_call_operand.vmem [shape: f32[1,256], index: 3, kind: input, shape index: {}]   ;;  %s323_s4 = inlined_call_operand.hbm [shape: f32[1,128], index: 4, kind: output, shape index: {}]  }
   0x1   :  { %10 = vsyncpa [#allocation7], 0  ;;  %s28_s17 = sshll.u32 %s320_s1, 4  ;;  %s29_s17 = int_to_ptr.hbm [resolvable:$true] %s28_s17 }
   0x2   :  { %11 = vsyncpa [#allocation5], 0  ;;  %s272_s18 = smov [#allocation6]   ;;  %s17_s22 = sshll.u32 %s319_s0, 4  ;;  %s18_s22 = int_to_ptr.hbm [resolvable:$true] %s17_s22 }
   0x3   :  { %s30_s19 = sshll.u32 %s272_s18, 4  ;;  %s273_s23 = smov [#allocation3]   ;;  %s31_s19 = int_to_ptr.vmem [resolvable:$true] %s30_s19 }
   0x4   :  { %33 = dma.hbm_to_vmem [thread:$0]  %s29_s17, 16, %s31_s19, [#allocation7]  }
   0x5   :  { %s19_s24 = sshll.u32 %s273_s23, 4  ;;  %s38_s27 = sshll.u32 %s321_s2, 4  ;;  %s20_s24 = int_to_ptr.vmem [resolvable:$true] %s19_s24  ;;  %s39_s27 = int_to_ptr.hbm [resolvable:$true] %s38_s27 }
   0x6   :  { %22 = dma.hbm_to_vmem [thread:$0]  %s18_s22, 16, %s20_s24, [#allocation4]  }
   0x7   :  { %s274_s1 = smov [#allocation8]   ;;  %s275_s29 = smov 256  }
   0x8   :  { %s40_s28 = sshll.u32 %s274_s1, 4  ;;  %s276_s30 = smov 16   ;;  %s41_s28 = int_to_ptr.vmem [resolvable:$true] %s40_s28 }
   0x9   :  { %46 = dma.hbm_to_vmem [thread:$0]  %s39_s27, 4096, %s41_s28, [#allocation7], %s275_s29, %s275_s29, %s276_s30  }
   0xa   :  { %266 = dma.done.wait [#allocation4], 16  }
   0xb   :  { %267 = vsyncadd [#allocation4], 4294967280 }
   0xc   :  { %268 = dma.done.wait [#allocation7], 4112  }
   0xd   :  { %269 = vsyncadd [#allocation7], 4294963184  ;;  %v277_v0 = vmov 0.0   ;;  %v98_v1 = vld [vmem:[#allocation8 + $0xf0] sm:$0xff]  ;;  %v96_v2 = vld [vmem:[#allocation8 + $0xe0] sm:$0xff]  ;;  %vm65_vm0 = vcmask 196608  }
   0xe   :  { %61 = vst [vmem:[#allocation2] sm:$0x1] %v277_v0  ;;  %101 = vmatpush.msra.mxu0 %v98_v1  ;;  %v94_v3 = vld [vmem:[#allocation8 + $0xd0] sm:$0xff]  ;;  %v92_v4 = vld [vmem:[#allocation8 + $0xc0] sm:$0xff]  ;;  %v62_v5 = vld [vmem:[#allocation3] sm:$0x1] }
   0xf   :  { %v63_v6 = vld [vmem:[#allocation6] sm:$0x1]  ;;  %v90_v7 = vld [vmem:[#allocation8 + $0xb0] sm:$0xff]  ;;  %v97_v10 = vld [vmem:[#allocation8 + $0xe8] sm:$0xff]  ;;  %s278_s5 = smov [#allocation9]   ;;  %s152_s9 = sshll.u32 %s323_s4, 4  ;;  %s153_s9 = int_to_ptr.hbm [resolvable:$true] %s152_s9 }
  0x10   :  { %102 = vmatpush.msra.mxu0 %v96_v2  ;;  %v64_v8 = vadd.f32 %v63_v6, %v62_v5  ;;  %v99_v9 = vld [vmem:[#allocation8 + $0xf8] sm:$0xff]  ;;  %v88_v11 = vld [vmem:[#allocation8 + $0xa0] sm:$0xff]  ;;  %v86_v13 = vld [vmem:[#allocation8 + $0x90] sm:$0xff]  ;;  %s150_s6 = sshll.u32 %s278_s5, 4  ;;  %s151_s6 = int_to_ptr.vmem [resolvable:$true] %s150_s6 }
  0x11   :  { %124 = vmatpush.msra.mxu1 %v99_v9  ;;  %v95_v12 = vld [vmem:[#allocation8 + $0xd8] sm:$0xff]  ;;  %v93_v14 = vld [vmem:[#allocation8 + $0xc8] sm:$0xff]  ;;  %v84_v15 = vld [vmem:[#allocation8 + $0x80] sm:$0xff] }
  0x12   :  { %103 = vmatpush.msra.mxu0 %v94_v3  ;;  %66 = vst.msk [vmem:[#allocation2] sm:$0x1] %vm65_vm0, %v64_v8  ;;  %v91_v16 = vld [vmem:[#allocation8 + $0xb8] sm:$0xff]  ;;  %v82_v17 = vld [vmem:[#allocation8 + $0x70] sm:$0xff]  ;;  %v89_v18 = vld [vmem:[#allocation8 + $0xa8] sm:$0xff] }
  0x13   :  { %125 = vmatpush.msra.mxu1 %v97_v10  ;;  %v80_v19 = vld [vmem:[#allocation8 + $0x60] sm:$0xff]  ;;  %v87_v20 = vld [vmem:[#allocation8 + $0x98] sm:$0xff]  ;;  %v78_v21 = vld [vmem:[#allocation8 + $0x50] sm:$0xff] }
  0x14   :  { %104 = vmatpush.msra.mxu0 %v92_v4  ;;  %v85_v22 = vld [vmem:[#allocation8 + $0x88] sm:$0xff]  ;;  %v76_v23 = vld [vmem:[#allocation8 + $0x40] sm:$0xff]  ;;  %v83_v24 = vld [vmem:[#allocation8 + $0x78] sm:$0xff] }
  0x15   :  { %126 = vmatpush.msra.mxu1 %v95_v12  ;;  %v74_v25 = vld [vmem:[#allocation8 + $0x30] sm:$0xff]  ;;  %v81_v26 = vld [vmem:[#allocation8 + $0x68] sm:$0xff]  ;;  %v72_v27 = vld [vmem:[#allocation8 + $0x20] sm:$0xff] }
  0x16   :  { %105 = vmatpush.msra.mxu0 %v90_v7  ;;  %v79_v28 = vld [vmem:[#allocation8 + $0x58] sm:$0xff]  ;;  %v70_v29 = vld [vmem:[#allocation8 + $0x10] sm:$0xff]  ;;  %v77_v30 = vld [vmem:[#allocation8 + $0x48] sm:$0xff] }
  0x17   :  { %127 = vmatpush.msra.mxu1 %v93_v14  ;;  %v68_v31 = vld [vmem:[#allocation8] sm:$0xff]  ;;  %v75_v32 = vld [vmem:[#allocation8 + $0x38] sm:$0xff]  ;;  %v73_v34 = vld [vmem:[#allocation8 + $0x28] sm:$0xff] }
  0x18   :  { %106 = vmatpush.msra.mxu0 %v88_v11  ;;  %v71_v35 = vld [vmem:[#allocation8 + $0x18] sm:$0xff]  ;;  %v69_v36 = vld [vmem:[#allocation8 + $0x8] sm:$0xff]  ;;  %v100_v37 = vld [vmem:[%s322_s3] sm:$0x3] }
  0x19   :  { %128 = vmatpush.msra.mxu1 %v91_v16  ;;  %v67_v33 = vld [vmem:[#allocation2] sm:$0x1]  ;;  %v122_v40 = vperm.slane %v100_v37, 1 }
  0x1a   :  { %107 = vmatpush.msra.mxu0 %v86_v13 }
  0x1b   :  { %129 = vmatpush.msra.mxu1 %v89_v18 }
  0x1c   :  { %108 = vmatpush.msra.mxu0 %v84_v15 }
  0x1d   :  { %130 = vmatpush.msra.mxu1 %v87_v20 }
  0x1e   :  { %109 = vmatpush.msra.mxu0 %v82_v17 }
  0x1f   :  { %131 = vmatpush.msra.mxu1 %v85_v22 }
  0x20   :  { %110 = vmatpush.msra.mxu0 %v80_v19 }
  0x21   :  { %132 = vmatpush.msra.mxu1 %v83_v24 }
  0x22   :  { %111 = vmatpush.msra.mxu0 %v78_v21 }
  0x23   :  { %133 = vmatpush.msra.mxu1 %v81_v26 }
  0x24   :  { %112 = vmatpush.msra.mxu0 %v76_v23 }
  0x25   :  { %134 = vmatpush.msra.mxu1 %v79_v28 }
  0x26   :  { %113 = vmatpush.msra.mxu0 %v74_v25 }
  0x27   :  { %135 = vmatpush.msra.mxu1 %v77_v30 }
  0x28   :  { %114 = vmatpush.msra.mxu0 %v72_v27 }
  0x29   :  { %136 = vmatpush.msra.mxu1 %v75_v32 }
  0x2a   :  { %115 = vmatpush.msra.mxu0 %v70_v29 }
  0x2b   :  { %137 = vmatpush.msra.mxu1 %v73_v34 }
  0x2c   :  { %116 = vmatpush.msra.mxu0 %v68_v31 }
  0x2d   :  { %117 = vmatmul.f32.vlgmr.msra.gmra.mxu0 %v67_v33  ;;  %138 = vmatpush.msra.mxu1 %v71_v35 }
  0x2f   :  { %139 = vmatpush.msra.mxu1 %v69_v36 }
  0xaa   :  { %v118_v38 = vpop.f32.mrf.mxu0 }
  0xab   :  { %v119_v39 = vadd.f32 %v118_v38, %v100_v37 }
  0xad   :  { %140 = vmatmul.f32.vlgmr.msra.gmra.mxu1 %v119_v39 }
 0x12a   :  { %v141_v41 = vpop.f32.mrf.mxu1 }
 0x12b   :  { %v142_v42 = vadd.f32 %v141_v41, %v122_v40 }
 0x12d   :  { %144 = vst [vmem:[#allocation9] sm:$0x1] %v142_v42 }
 0x12e   :  { %155 = dma.vmem_to_hbm [thread:$0]  %s151_s6, 16, %s153_s9, [#allocation5]  }
 0x12f   :  { %270 = dma.done.wait [#allocation5], 16  }
 0x130   :  { %271 = vsyncadd [#allocation5], 4294967280 }
 0x131   :  { %160 = vsyncpa [#allocation4], 1 }
 0x132   :  { %161 = vsyncpa [#allocation7], 1 }
 0x133   :  { %162 = vsyncpa [#allocation5], 1 }

</bundles_post_ra>
